<compile_context>
chip_gen: v7x
topology: tpu7x:2x2x1
jax: 0.10.0
libtpu: 0.0.40
codegen_flags: <defaults>
</compile_context>

<pallas_src>
import functools

import jax
import jax.numpy as jnp
from jax import lax
from jax.experimental import pallas as pl
from jax.experimental.pallas import tpu as pltpu


def _round_up(x, m):
    return (x + m - 1) // m * m


def bert_pooler_kernel(x_ref, w_ref, b_ref, o_ref, *, tn):
    # x_ref: (B_pad, H_in)      resident CLS activations (bf16)
    # w_ref: (tn, H_in)         streamed weight tile, [out, in] layout (bf16)
    # b_ref: (1, H_out_pad)     resident full bias (f32)
    # o_ref: (B_pad, tn)        output tile
    j = pl.program_id(0)

    # Contract over the shared "in" axis (axis 1 of both) => x @ W_tile.T.
    # bf16 operands, f32 accumulation on the MXU; no in-kernel transpose.
    y = lax.dot_general(
        x_ref[...], w_ref[...],
        dimension_numbers=(((1,), (1,)), ((), ())),
        preferred_element_type=jnp.float32,
    )

    # Bias stays resident in VMEM; slice the lane-aligned tile for this step.
    start = pl.multiple_of(j * tn, 128)
    y = y + b_ref[:, pl.ds(start, tn)]          # broadcast (1, tn) over rows

    o_ref[...] = jnp.tanh(y).astype(o_ref.dtype)


def _pick_tile(h_out_pad):
    # Largest lane-dense tile that still leaves >= 2 grid steps (so v7x's two
    # TensorCores can split the weight stream). Tiny hidden sizes fall back to
    # one full (still 128-multiple, since padded) block.
    for cand in (512, 256, 128):
        if h_out_pad % cand == 0 and h_out_pad // cand >= 2:
            return cand
    return h_out_pad


def bert_pooler(hidden_states, weight, bias):
    """hidden_states: (B, S, H); weight: (H, H) [out, in]; bias: (H,)."""
    B, S, H = hidden_states.shape
    out_dtype = hidden_states.dtype
    out_itemsize = jnp.dtype(out_dtype).itemsize

    # ---- wrapper-side prep (cheap vs. the H*H weight stream) ----
    # CLS slice outside the kernel: only (B, H) ever reaches VMEM.
    cls = hidden_states[:, 0, :]

    # Pad batch to a multiple of 8 (sublane-dense) and the output-feature axis
    # to a multiple of 128 (lane-dense stores + even grid for megacore).
    B_pad = max(_round_up(B, 8), 8)
    H_out_pad = _round_up(H, 128)

    if B_pad != B:
        cls = jnp.pad(cls, ((0, B_pad - B), (0, 0)))
    w = weight
    b = bias
    if H_out_pad != H:
        w = jnp.pad(w, ((0, H_out_pad - H), (0, 0)))   # zero padded out-features
        b = jnp.pad(b, ((0, H_out_pad - H),))          # zero padded bias entries

    # bf16 operands halve weight DMA bytes; kernel accumulates in f32.
    cls = cls.astype(jnp.bfloat16)
    w = w.astype(jnp.bfloat16)
    b2d = b.reshape(1, H_out_pad).astype(jnp.float32)

    tn = _pick_tile(H_out_pad)
    grid_n = H_out_pad // tn

    # Explicit VMEM budget (double-buffered weight tiles dominate); keep it
    # inside v7x's 64 MiB physical / above v5e's 16 MiB scoped default.
    vmem_bytes = (
        2 * tn * H * 2            # weight double-buffer (bf16)
        + B_pad * H * 2           # resident CLS block (bf16)
        + 2 * B_pad * tn * 4      # output double-buffer (<= f32)
        + H_out_pad * 4           # resident bias (f32)
    )
    vmem_limit = int(min(max(2 * vmem_bytes, 32 << 20), 64 << 20))

    cost = pl.CostEstimate(
        flops=2 * B_pad * H * H_out_pad,
        transcendentals=B_pad * H_out_pad,                 # tanh
        bytes_accessed=(2 * H_out_pad * H                  # bf16 weight
                        + 2 * B_pad * H                    # bf16 CLS
                        + 4 * H_out_pad                    # f32 bias
                        + out_itemsize * B_pad * H_out_pad),
    )

    out = pl.pallas_call(
        functools.partial(bert_pooler_kernel, tn=tn),
        out_shape=jax.ShapeDtypeStruct((B_pad, H_out_pad), out_dtype),
        grid_spec=pltpu.PrefetchScalarGridSpec(
            num_scalar_prefetch=0,
            grid=(grid_n,),
            in_specs=[
                pl.BlockSpec((B_pad, H), lambda j: (0, 0)),      # CLS (resident)
                pl.BlockSpec((tn, H), lambda j: (j, 0)),         # weight tile (streamed)
                pl.BlockSpec((1, H_out_pad), lambda j: (0, 0)),  # bias (resident)
            ],
            out_specs=pl.BlockSpec((B_pad, tn), lambda j: (0, j)),
        ),
        compiler_params=pltpu.CompilerParams(
            dimension_semantics=("parallel",),
            vmem_limit_bytes=vmem_limit,
        ),
        cost_estimate=cost,
    )(cls, w, b2d)

    # Strip batch / output-feature padding.
    return out[:B, :H]


if __name__ == "__main__":
    B, S, H = 2, 8, 32  # small demo shapes: batch=2, seq=8, hidden=32

    key = jax.random.PRNGKey(0)
    k_h, k_w, k_b = jax.random.split(key, 3)

    hidden_states = jax.random.normal(k_h, (B, S, H), dtype=jnp.float32)
    # Deterministic synthetic params (nn.Linear(hidden, hidden) shapes).
    weight = jax.random.normal(k_w, (H, H), dtype=jnp.float32) * (1.0 / jnp.sqrt(H))
    bias = jax.random.normal(k_b, (H,), dtype=jnp.float32) * 0.01

    out = bert_pooler(hidden_states, weight, bias)
    out = jax.block_until_ready(out)

    # Reference check in plain JAX (same semantics as the PyTorch forward).
    # Operands are bf16 in the kernel (f32 accumulation), so compare against
    # the f32 reference with a bf16-appropriate tolerance.
    ref = jnp.tanh(hidden_states[:, 0] @ weight.T + bias)
    assert out.shape == (B, H)
    assert jnp.allclose(out, ref, atol=3e-2, rtol=3e-2)

    print("KERNEL_OK")
</pallas_src>

<mosaic_0001>
module attributes {stable_mosaic.version = 11 : i64} {
  func.func @bert_pooler_kernel(%arg0: i32, %arg1: memref<8x32xbf16, #tpu.memory_space<vmem>>, %arg2: memref<128x32xbf16, #tpu.memory_space<vmem>>, %arg3: memref<1x128xf32, #tpu.memory_space<vmem>>, %arg4: memref<8x128xf32, #tpu.memory_space<vmem>>) attributes {dimension_semantics = [#tpu.dimension_semantics<parallel>], iteration_bounds = array<i64: 1>, scalar_prefetch = 0 : i64, scratch_operands = 0 : i64, tpu.core_type = #tpu.core_type<tc>, window_params = [{pipeline_mode = #tpu.pipeline_mode<synchronous>, transform_indices = @transform_0, window_bounds = array<i64: 8, 32>}, {transform_indices = @transform_1, window_bounds = array<i64: 128, 32>}, {pipeline_mode = #tpu.pipeline_mode<synchronous>, transform_indices = @transform_2, window_bounds = array<i64: 1, 128>}, {transform_indices = @transform_3, window_bounds = array<i64: 8, 128>}]} {
    %c0 = arith.constant 0 : index
    %c0_0 = arith.constant 0 : index
    %0 = vector.load %arg1[%c0, %c0_0] : memref<8x32xbf16, #tpu.memory_space<vmem>>, vector<8x32xbf16>
    %c0_1 = arith.constant 0 : index
    %c0_2 = arith.constant 0 : index
    %1 = vector.load %arg2[%c0_1, %c0_2] : memref<128x32xbf16, #tpu.memory_space<vmem>>, vector<128x32xbf16>
    %cst = arith.constant dense<0.000000e+00> : vector<8x128xf32>
    %2 = tpu.matmul %0, %1, %cst {dimension_numbers = #tpu.dot_dimension_numbers<[1], [1], [0], [0], [0, 0, 1, 0], [], []>} : vector<8x32xbf16>, vector<128x32xbf16>, vector<8x128xf32> -> vector<8x128xf32>
    %c128_i32 = arith.constant 128 : i32
    %3 = arith.muli %arg0, %c128_i32 : i32
    %4 = tpu.assume_multiple %3, 128 : i32
    %c0_3 = arith.constant 0 : index
    %5 = arith.index_cast %4 : i32 to index
    %6 = vector.load %arg3[%c0_3, %5] : memref<1x128xf32, #tpu.memory_space<vmem>>, vector<1x128xf32>
    %7 = vector.broadcast %6 : vector<1x128xf32> to vector<8x128xf32>
    %8 = arith.addf %2, %7 : vector<8x128xf32>
    %9 = math.tanh %8 : vector<8x128xf32>
    %c0_4 = arith.constant 0 : index
    %c0_5 = arith.constant 0 : index
    %10 = vector.load %arg4[%c0_4, %c0_5] : memref<8x128xf32, #tpu.memory_space<vmem>>, vector<8x128xf32>
    tpu.vector_store %arg4[%c0_4, %c0_5], %9 {strides = array<i32>} : memref<8x128xf32, #tpu.memory_space<vmem>>, vector<8x128xf32>,
    return
  }
  func.func @transform_0(%arg0: i32) -> (i32, i32) {
    %c0_i32 = arith.constant 0 : i32
    %c0_i32_0 = arith.constant 0 : i32
    %c0_i32_1 = arith.constant 0 : i32
    return %c0_i32, %c0_i32_0 : i32, i32
  }
  func.func @transform_1(%arg0: i32) -> (i32, i32) {
    %c0_i32 = arith.constant 0 : i32
    %c0_i32_0 = arith.constant 0 : i32
    return %arg0, %c0_i32 : i32, i32
  }
  func.func @transform_2(%arg0: i32) -> (i32, i32) {
    %c0_i32 = arith.constant 0 : i32
    %c0_i32_0 = arith.constant 0 : i32
    %c0_i32_1 = arith.constant 0 : i32
    return %c0_i32, %c0_i32_0 : i32, i32
  }
  func.func @transform_3(%arg0: i32) -> (i32, i32) {
    %c0_i32 = arith.constant 0 : i32
    %c0_i32_0 = arith.constant 0 : i32
    return %c0_i32, %arg0 : i32, i32
  }
}

</mosaic_0001>

<bundles_post_ra>
// kernel: tpu_custom_call.1
= control target key start
LH: loop header
LB: loop body
LE: loop exit
PB: predicated region body
PF: predicated region fallthrough
CT: control target
= control target key end

     0   :  { %v245_v1 = vmov 0.0   ;;  %vm84_vm0 = vcmask 261120   ;;  %vm246_vm1 = vmmov 0   ;;  %s319_s0 = inlined_call_operand.vmem [shape: bf16[8,32], index: 0, kind: input, shape index: {}]   ;;  %s320_s1 = inlined_call_operand.vmem [shape: bf16[128,32], index: 1, kind: input, shape index: {}]   ;;  %s321_s2 = inlined_call_operand.vmem [shape: f32[1,128], index: 2, kind: input, shape index: {}]   ;;  %s322_s3 = inlined_call_operand.hbm [shape: f32[8,128], index: 3, kind: output, shape index: {}]  }
   0x1   :  { %v211_v0 = vld [vmem:[%s320_s1] sm:$0xff]   ;;  %188 = vmatprep.subr.bf16.mxu0 %v245_v1  ;;  %v212_v3 = vld [vmem:[%s320_s1 + $0x8] sm:$0xff]   ;;  %204 = vmatprep.mubr.msk.bf16.mxu0 %vm246_vm1, %v245_v1 }
   0x2   :  { %v89_v2 = vsel %vm84_vm0, %v211_v0, 0  ;;  %v92_v4 = vsel %vm84_vm0, %v212_v3, 0 }
   0x3   :  { %189 = vmatpush3.bf16.xpose.msra.mxu0 %v89_v2 }
   0x4   :  { %190 = vmatprep.subr.bf16.mxu0 %v245_v1 }
   0x5   :  { %8 = vsyncpa [#allocation3], 0  ;;  %v213_v5 = vld [vmem:[%s320_s1 + $0x10] sm:$0xff]   ;;  %v214_v7 = vld [vmem:[%s320_s1 + $0x18] sm:$0xff]  }
   0x6   :  { %v95_v6 = vsel %vm84_vm0, %v213_v5, 0  ;;  %v98_v8 = vsel %vm84_vm0, %v214_v7, 0  ;;  %v215_v9 = vld [vmem:[%s320_s1 + $0x20] sm:$0xff]   ;;  %v216_v11 = vld [vmem:[%s320_s1 + $0x28] sm:$0xff]   ;;  %v217_v13 = vld [vmem:[%s320_s1 + $0x30] sm:$0xff]  }
   0x7   :  { %v101_v10 = vsel %vm84_vm0, %v215_v9, 0  ;;  %v104_v12 = vsel %vm84_vm0, %v216_v11, 0  ;;  %v107_v14 = vsel %vm84_vm0, %v217_v13, 0  ;;  %v218_v15 = vld [vmem:[%s320_s1 + $0x38] sm:$0xff]   ;;  %v16_v17 = vld [vmem:[%s319_s0] sm:$0xf] }
   0x8   :  { %v110_v16 = vsel %vm84_vm0, %v218_v15, 0  ;;  %v169_v18 = vld [vmem:[%s321_s2] ss:$0 sm:$0xff]  ;;  %s247_s1 = smov [#allocation2]  }
   0x9   :  { %s160_s5 = sshll.u32 %s247_s1, 4  ;;  %s161_s5 = int_to_ptr.vmem [resolvable:$true] %s160_s5 }
   0xa   :  { %s221_s6 = scalar_lea.vmem %s161_s5, 128  ;;  %p226_p1 = scmp.lt.s32.totalorder %s161_s5, %s161_s5 }
   0xb   :  { %191 = vmatpush3.bf16.xpose.msra.mxu0 %v92_v4  ;;  %p222_p0 = scmp.ne.s32.totalorder %s161_s5, %s221_s6  ;;  %p227_p2 = scmp.lt.s32.totalorder %s221_s6, %s221_s6 }
   0xc   :  { %192 = vmatprep.subr.bf16.mxu0 %v245_v1 }
   0xd   :  { %p228_p3 = por %p227_p2, %p226_p1 }
   0xf   :  { %p229_p4 = pnand %p228_p3, %p222_p0 }
  0x13   :  { %193 = vmatpush3.bf16.xpose.msra.mxu0 %v95_v6 }
  0x14   :  { %194 = vmatprep.subr.bf16.mxu0 %v245_v1 }
  0x1b   :  { %195 = vmatpush3.bf16.xpose.msra.mxu0 %v98_v8 }
  0x1c   :  { %196 = vmatprep.subr.bf16.mxu0 %v245_v1 }
  0x23   :  { %197 = vmatpush3.bf16.xpose.msra.mxu0 %v101_v10 }
  0x24   :  { %198 = vmatprep.subr.bf16.mxu0 %v245_v1 }
  0x2b   :  { %199 = vmatpush3.bf16.xpose.msra.mxu0 %v104_v12 }
  0x2c   :  { %200 = vmatprep.subr.bf16.mxu0 %v245_v1 }
  0x33   :  { %201 = vmatpush3.bf16.xpose.msra.mxu0 %v107_v14 }
  0x34   :  { %202 = vmatprep.subr.bf16.mxu0 %v245_v1 }
  0x3b   :  { %203 = vmatpush3.bf16.xpose.msra.mxu0 %v110_v16 }
  0x42   :  { %205 = vmatmul.mubr.msk.bf16.vlgmr.msra.gmra.mrb[0].mxu0 %vm84_vm0, %v16_v17 }
 0x115   :  { %v146_v19 = vpop.f32.mrb[0].mxu0 }
 0x116   :  { %v147_v20 = vadd.f32 %v169_v18, %v146_v19  ;;  %v206_v21 = vpop.f32.mrb[1].mxu0 }
 0x117   :  { %v149_v22 = vpop.f32.mrb[2].mxu0 }
 0x118   :  { %219 = vtanh.f32 %v147_v20  ;;  %v207_v23 = vpop.f32.mrb[3].mxu0 }
 0x122   :  { %v220_v24 = vpop.eup %219 }
 0x123   :  { %153 = vst [vmem:[#allocation2] sm:$0xff] %v220_v24 }
 0x124   :  { %232 = shalt.err (!%p229_p4)
}
 0x125   :  { %s233_s7 = scalar_lea.hbm %s322_s3, 128 }
 0x126   :  { %p234_p5 = scmp.ne.s32.totalorder %s322_s3, %s233_s7  ;;  %p237_p6 = scmp.lt.u32.totalorder %s233_s7, %s322_s3 }
 0x128   :  { %p239_p7 = pnand %p237_p6, %p234_p5 }
 0x12a   :  { %242 = shalt.err (!%p239_p7)
}
 0x12b   :  { %163 = dma.vmem_to_hbm [thread:$0]  %s161_s5, 128, %s322_s3, [#allocation3]  }
 0x12c   :  { %243 = dma.done.wait [#allocation3], 128  }
 0x12d   :  { %244 = vsyncadd [#allocation3], 4294967168 }
 0x12e   :  { %167 = vsyncpa [#allocation3], 1 }

</bundles_post_ra>
